<compile_context>
chip_gen: v7x
topology: tpu7x:2x2x1
jax: 0.10.0
libtpu: 0.0.40
codegen_flags: <defaults>
</compile_context>

<pallas_src>
import math
import random

import numpy as np
import jax
import jax.numpy as jnp
from jax.experimental import pallas as pl
from jax.experimental.pallas import tpu as pltpu


def _round_up(x, m):
    return ((x + m - 1) // m) * m


def _largest_divisor_tile(dim_pad, t_max, align, prefer=None):
    """Largest multiple of `align` <= min(t_max, dim_pad) dividing dim_pad.

    `dim_pad` must already be a multiple of `align`.  When possible, prefer
    tiles that are multiples of `prefer` (the 256-wide MXU on v6e/v7x).
    """
    cap = min(t_max, dim_pad)
    cands = [c for c in range(align, cap + 1, align) if dim_pad % c == 0]
    if not cands:
        return align
    if prefer is not None:
        pref = [c for c in cands if c % prefer == 0]
        if pref:
            return max(pref)
    return max(cands)


def _plan_m(M, tm_max):
    """Pick (tm, M_pad): bf16 needs sublane packs of 16; avoid over-padding."""
    m16 = _round_up(max(M, 1), 16)
    tm = _largest_divisor_tile(m16, tm_max, 16, prefer=256)
    if tm < 128 and m16 > tm_max:
        # Pathological divisor structure (e.g. 16 * large prime): accept a
        # small over-pad with a healthy 256-row tile instead of tm=16.
        tm = min(tm_max, 256)
        return tm, _round_up(m16, tm)
    return tm, m16


# -----------------------------------------------------------------------------
# Pallas kernels: tiled GEMM  out = x @ W_eff^T + b0   (LoRA already folded in)
# -----------------------------------------------------------------------------
def _gemm_bias_kernel_f32out(x_ref, w_ref, b_ref, o_ref):
    """f32 output: accumulate directly into the resident output block."""
    k = pl.program_id(2)

    @pl.when(k == 0)
    def _init():
        # Initialize with the (broadcast) bias; no separate epilogue needed.
        o_ref[...] = jnp.broadcast_to(b_ref[...], o_ref.shape)

    o_ref[...] += jnp.dot(x_ref[...], w_ref[...],
                          preferred_element_type=jnp.float32)


def _gemm_bias_kernel_lowp_out(x_ref, w_ref, b_ref, o_ref, acc_ref):
    """Low-precision (e.g. bf16) output: f32 VMEM accumulator + epilogue cast."""
    k = pl.program_id(2)

    @pl.when(k == 0)
    def _init():
        acc_ref[...] = jnp.zeros_like(acc_ref)

    acc_ref[...] += jnp.dot(x_ref[...], w_ref[...],
                            preferred_element_type=jnp.float32)

    @pl.when(k == pl.num_programs(2) - 1)
    def _epilogue():
        o_ref[...] = (acc_ref[...] + b_ref[...]).astype(o_ref.dtype)


# -----------------------------------------------------------------------------
# Wrapper: hoisted weight prep + per-call Pallas GEMM
# -----------------------------------------------------------------------------
def make_qpa_lora_apply(W0, b0, A, Blora, alpha, r,
                        tm_max=512, tn_max=512, tk_max=512,
                        compute_dtype=jnp.bfloat16, out_dtype=jnp.float32,
                        small_problem_threshold=1 << 20, force_pallas=False):
    """Fold the LoRA delta and pre-pad the weights ONCE; return apply(x).

    W0: (out, H), b0: (out,), A: (out, r), Blora: (r, H).
    apply(x): x (B, S, H) float32 -> (B, S, out) in `out_dtype`.
    """
    out_features, H = W0.shape
    scale = float(alpha) / float(r)

    # ---- Fold the LoRA delta into an effective weight (forward-only fold). ---
    # TODO(synk): if this kernel is reused for training with separate LoRA
    # gradients (or non-zero dropout), the two-branch form must be restored.
    W_eff = (W0.astype(jnp.float32)
             + scale * (A.astype(jnp.float32) @ Blora.astype(jnp.float32)))

    # ---- Pad only to the hardware minimum (128 lanes), not to the tile. ------
    K_pad = _round_up(H, 128)
    N_pad = _round_up(out_features, 128)
    tk = _largest_divisor_tile(K_pad, tk_max, 128, prefer=256)
    tn0 = _largest_divisor_tile(N_pad, tn_max, 128, prefer=256)

    Wp = jnp.pad(W_eff.T, ((0, K_pad - H), (0, N_pad - out_features))
                 ).astype(compute_dtype)                       # (K_pad, N_pad)
    bp = jnp.pad(b0.astype(jnp.float32), (0, N_pad - out_features)
                 ).reshape(1, N_pad)                           # (1, N_pad) f32
    Wp = jax.device_put(Wp)
    bp = jax.device_put(bp)

    f32_out = (jnp.dtype(out_dtype) == jnp.dtype(jnp.float32))

    def apply(x):
        B, S, H_in = x.shape
        assert H_in == H
        M = B * S

        # Small-problem fast path: padded-Pallas overhead dominates here.
        if (not force_pallas) and (M * H * out_features < small_problem_threshold):
            y = x.reshape(M, H) @ W_eff.T + b0
            return y.reshape(B, S, out_features).astype(out_dtype)

        tm, M_pad = _plan_m(M, tm_max)
        tn = tn0

        # Guarantee >=2 parallel output blocks when possible (v7x: 2 TCs/chip).
        while (M_pad // tm) * (N_pad // tn) < 2:
            if tn >= 256 and tn % 256 == 0:
                tn //= 2          # still a multiple of 128, still divides N_pad
            elif tm >= 32 and tm % 32 == 0:
                tm //= 2          # still a multiple of 16, still divides M_pad
            else:
                break

        # Cast to bf16 BEFORE padding; pad in the compute dtype.
        xm = x.reshape(M, H).astype(compute_dtype)
        xm = jnp.pad(xm, ((0, M_pad - M), (0, K_pad - H)))

        grid = (M_pad // tm, N_pad // tn, K_pad // tk)
        in_specs = [
            pl.BlockSpec((tm, tk), lambda i, j, k: (i, k)),    # x rows
            pl.BlockSpec((tk, tn), lambda i, j, k: (k, j)),    # W_eff^T tile
            pl.BlockSpec((1, tn), lambda i, j, k: (0, j)),     # bias (f32)
        ]
        out_spec = pl.BlockSpec((tm, tn), lambda i, j, k: (i, j))

        if f32_out:
            kernel = _gemm_bias_kernel_f32out
            scratch = []                                       # acc == o_ref
        else:
            kernel = _gemm_bias_kernel_lowp_out
            scratch = [pltpu.VMEM((tm, tn), jnp.float32)]

        out_m = pl.pallas_call(
            kernel,
            out_shape=jax.ShapeDtypeStruct((M_pad, N_pad), out_dtype),
            grid_spec=pltpu.PrefetchScalarGridSpec(
                num_scalar_prefetch=0,
                grid=grid,
                in_specs=in_specs,
                out_specs=out_spec,
                scratch_shapes=scratch,
            ),
            compiler_params=pltpu.CompilerParams(
                dimension_semantics=("parallel", "parallel", "arbitrary")),
        )(xm, Wp, bp)

        return out_m[:M, :out_features].reshape(B, S, out_features)

    return jax.jit(apply)


# -----------------------------------------------------------------------------
# Plain-JAX weight-generation glue (QT_HyperNet): small statevector sim + MLPs
# -----------------------------------------------------------------------------
def linear_init(key, fan_in, fan_out):
    """Deterministic PyTorch-like Linear init."""
    k1, k2 = jax.random.split(key)
    bound = 1.0 / math.sqrt(fan_in)
    W = jax.random.uniform(k1, (fan_out, fan_in), minval=-bound, maxval=bound,
                           dtype=jnp.float32)
    b = jax.random.uniform(k2, (fan_out,), minval=-bound, maxval=bound,
                           dtype=jnp.float32)
    return W, b


def ry_mat(theta):
    c = jnp.cos(theta / 2.0)
    s = jnp.sin(theta / 2.0)
    return jnp.stack([jnp.stack([c, -s]), jnp.stack([s, c])])


def qlayer_forward(thetas, n_wires):
    """Statevector sim of QLayer (RY-all + CNOT-chain blocks) + post-processing.

    TODO(synk): torchquantum has no Pallas equivalent; the 2^n-dim statevector
    simulation is done in plain JAX (n is tiny).
    """
    dim = 2 ** n_wires
    I2 = jnp.eye(2, dtype=jnp.float32)
    CNOT = jnp.array([[1, 0, 0, 0],
                      [0, 1, 0, 0],
                      [0, 0, 0, 1],
                      [0, 0, 1, 0]], dtype=jnp.float32)

    def gate_on_wire(g, w):
        M = jnp.array([[1.0]], dtype=jnp.float32)
        for q in range(n_wires):
            M = jnp.kron(M, g if q == w else I2)
        return M

    def cnot_on(c):
        M = jnp.array([[1.0]], dtype=jnp.float32)
        q = 0
        while q < n_wires:
            if q == c:
                M = jnp.kron(M, CNOT)
                q += 2
            else:
                M = jnp.kron(M, I2)
                q += 1
        return M

    state = jnp.zeros((dim,), dtype=jnp.float32).at[0].set(1.0)
    n_blocks = thetas.shape[0]
    for k in range(n_blocks):
        for w in range(n_wires):
            state = gate_on_wire(ry_mat(thetas[k, w]), w) @ state
        for c in range(n_wires - 1):
            state = cnot_on(c) @ state

    easy_scale_coeff = 2 ** (n_wires - 1)
    gamma, beta, alpha_q = 0.1, 0.6, 0.15
    p = jnp.abs(state) ** 2
    xq = p.reshape(dim, 1)
    xq = (beta * jnp.tanh(gamma * easy_scale_coeff * xq)) ** alpha_q
    xq = xq - jnp.mean(xq)
    return xq


def generate_qubit_states(n_qubit, num_vectors):
    total = 2 ** n_qubit
    idx = random.sample(range(total), num_vectors)
    idx = np.array(idx, dtype=np.int64)[:, None]                       # (nv, 1)
    bits = ((idx[:, :, None] & (1 << np.arange(n_qubit, dtype=np.int64))) > 0)
    bits = bits.astype(np.float32) * 2.0 - 1.0                         # (nv, 1, n)
    return jnp.asarray(bits)


def mapping_forward(params, X):
    # MappingModel: chain of Linear layers with no activations.
    for W, b in params:
        X = X @ W.T + b
    return X


def qt_hypernet_forward(hp):
    probs = qlayer_forward(hp["thetas"], hp["n_qubit"]).reshape(-1)
    probs = probs[: hp["batch_size"]].reshape(hp["batch_size"], 1, 1)
    qstates = generate_qubit_states(hp["n_qubit"], hp["batch_size"])
    qstates = qstates[: hp["weight_length"]]
    combined = jnp.concatenate([qstates, probs], axis=2)               # (bs, 1, nq+1)
    out = mapping_forward(hp["mapping_params"], combined)              # (bs, 1, 32)
    out = out @ hp["fc1_W"].T + hp["fc1_b"]                            # (bs, 1, chunk)
    flat = out.reshape(-1)[: hp["weight_length"]]
    return flat - jnp.mean(flat)


def build_hypernetworks(key, vocab_size, n_sub, chunk_size, qnn_depth):
    hyper_hidden_size = 1
    hps = []
    for _ in range(n_sub):
        weight_length = int(np.ceil(vocab_size * hyper_hidden_size / n_sub))
        out_dim_MPS = 32
        out_dim_MLP = chunk_size
        bs = int(np.ceil(weight_length / out_dim_MLP))
        n_qubit = int(np.ceil(np.log2(bs)))

        key, kt = jax.random.split(key)
        # RY rotation params (deterministic synthetic init, stands in for tq init)
        thetas = jax.random.uniform(kt, (qnn_depth, n_qubit),
                                    minval=-np.pi, maxval=np.pi,
                                    dtype=jnp.float32)

        sizes = [n_qubit + 1, 32, 64, 128, 128, 64, 32, out_dim_MPS]
        mparams = []
        for i in range(len(sizes) - 1):
            key, kk = jax.random.split(key)
            mparams.append(linear_init(kk, sizes[i], sizes[i + 1]))
        key, kk = jax.random.split(key)
        fc1_W, fc1_b = linear_init(kk, out_dim_MPS, out_dim_MLP)

        hps.append(dict(thetas=thetas, n_qubit=n_qubit, batch_size=bs,
                        weight_length=weight_length, mapping_params=mparams,
                        fc1_W=fc1_W, fc1_b=fc1_b))
    return key, hps


# -----------------------------------------------------------------------------
if __name__ == "__main__":
    random.seed(0)
    key = jax.random.PRNGKey(0)

    # Small shapes consistent with the module.
    batch, seq, hidden = 2, 8, 32
    out_features = 32
    r, lora_alpha = 4, 8.0
    n_sub_hypernetwork, chunk_size, qnn_depth = 2, 16, 2

    # Frozen original Linear layer (out_features, hidden) + bias.
    key, k0 = jax.random.split(key)
    W0, b0 = linear_init(k0, hidden, out_features)

    # Hypernetwork-generated LoRA weights (plain-JAX glue).
    vocab_size = out_features * r + r * hidden
    key, hps = build_hypernetworks(key, vocab_size, n_sub_hypernetwork,
                                   chunk_size, qnn_depth)
    gen_weights = [qt_hypernet_forward(hp) for hp in hps]
    generated = jnp.concatenate(gen_weights, axis=0).reshape(-1)[:vocab_size]
    A = generated[: out_features * r].reshape(out_features, r).astype(jnp.float32)
    Blora = generated[out_features * r:].reshape(r, hidden).astype(jnp.float32)

    # Input activations.
    key, kx = jax.random.split(key)
    x = jax.random.normal(kx, (batch, seq, hidden), dtype=jnp.float32)

    # Weight fold / transpose / pad / bf16-cast hoisted out of the call path.
    # force_pallas=True so the demo exercises the kernel despite tiny shapes.
    apply_lora = make_qpa_lora_apply(W0, b0, A, Blora, lora_alpha, r,
                                     force_pallas=True)
    y = apply_lora(x)
    jax.block_until_ready(y)
    assert y.shape == (batch, seq, out_features)
    assert bool(jnp.all(jnp.isfinite(y)))

    # Reference with identical dtype policy (bf16 operands, f32 accumulate).
    scale = lora_alpha / r
    W_eff = W0 + scale * (A @ Blora)
    x_bf = x.reshape(-1, hidden).astype(jnp.bfloat16).astype(jnp.float32)
    W_bf = W_eff.T.astype(jnp.bfloat16).astype(jnp.float32)
    y_ref = (x_bf @ W_bf + b0).reshape(batch, seq, out_features)
    assert bool(jnp.allclose(y, y_ref, rtol=2e-3, atol=2e-3))

    # Second check: non-multiple-of-128 shapes exercise the new K/M/N padding,
    # divisor tile selection and the >=2-parallel-block split.
    key, kw, kx2, ka, kb = jax.random.split(key, 5)
    H2, out2, b2, s2 = 320, 200, 3, 70
    W0b, b0b = linear_init(kw, H2, out2)
    A2 = 0.02 * jax.random.normal(ka, (out2, r), dtype=jnp.float32)
    B2 = 0.02 * jax.random.normal(kb, (r, H2), dtype=jnp.float32)
    x2 = jax.random.normal(kx2, (b2, s2, H2), dtype=jnp.float32)

    apply_lora2 = make_qpa_lora_apply(W0b, b0b, A2, B2, lora_alpha, r,
                                      force_pallas=True)
    y2 = apply_lora2(x2)
    jax.block_until_ready(y2)
    assert y2.shape == (b2, s2, out2)

    W_eff2 = W0b + scale * (A2 @ B2)
    x2_bf = x2.reshape(-1, H2).astype(jnp.bfloat16).astype(jnp.float32)
    W2_bf = W_eff2.T.astype(jnp.bfloat16).astype(jnp.float32)
    y2_ref = (x2_bf @ W2_bf + b0b).reshape(b2, s2, out2)
    assert bool(jnp.allclose(y2, y2_ref, rtol=2e-3, atol=2e-3))

    print("KERNEL_OK")
</pallas_src>

<mosaic_0001>
module attributes {stable_mosaic.version = 11 : i64} {
  func.func @_gemm_bias_kernel_f32out(%arg0: i32, %arg1: i32, %arg2: i32, %arg3: memref<16x128xbf16, #tpu.memory_space<vmem>>, %arg4: memref<128x128xbf16, #tpu.memory_space<vmem>>, %arg5: memref<1x128xf32, #tpu.memory_space<vmem>>, %arg6: memref<16x128xf32, #tpu.memory_space<vmem>>) attributes {dimension_semantics = [#tpu.dimension_semantics<parallel>, #tpu.dimension_semantics<parallel>, #tpu.dimension_semantics<arbitrary>], iteration_bounds = array<i64: 1, 1, 1>, scalar_prefetch = 0 : i64, scratch_operands = 0 : i64, tpu.core_type = #tpu.core_type<tc>, window_params = [{transform_indices = @transform_0, window_bounds = array<i64: 16, 128>}, {transform_indices = @transform_1, window_bounds = array<i64: 128, 128>}, {transform_indices = @transform_2, window_bounds = array<i64: 1, 128>}, {transform_indices = @transform_3, window_bounds = array<i64: 16, 128>}]} {
    %c0_i32 = arith.constant 0 : i32
    %0 = arith.cmpi eq, %arg2, %c0_i32 : i32
    %1 = arith.extui %0 : i1 to i32
    %c0_i32_0 = arith.constant 0 : i32
    %2 = arith.cmpi ne, %1, %c0_i32_0 : i32
    scf.if %2 {
      %c0_8 = arith.constant 0 : index
      %c0_9 = arith.constant 0 : index
      %9 = vector.load %arg5[%c0_8, %c0_9] : memref<1x128xf32, #tpu.memory_space<vmem>>, vector<1x128xf32>
      %10 = vector.shape_cast %9 : vector<1x128xf32> to vector<1x128xf32>
      %11 = vector.broadcast %10 : vector<1x128xf32> to vector<16x128xf32>
      %c0_10 = arith.constant 0 : index
      %c0_11 = arith.constant 0 : index
      %12 = vector.load %arg6[%c0_10, %c0_11] : memref<16x128xf32, #tpu.memory_space<vmem>>, vector<16x128xf32>
      tpu.vector_store %arg6[%c0_10, %c0_11], %11 {strides = array<i32>} : memref<16x128xf32, #tpu.memory_space<vmem>>, vector<16x128xf32>,
    } else {
    }
    %c0 = arith.constant 0 : index
    %c0_1 = arith.constant 0 : index
    %3 = vector.load %arg6[%c0, %c0_1] : memref<16x128xf32, #tpu.memory_space<vmem>>, vector<16x128xf32>
    %c0_2 = arith.constant 0 : index
    %c0_3 = arith.constant 0 : index
    %4 = vector.load %arg3[%c0_2, %c0_3] : memref<16x128xbf16, #tpu.memory_space<vmem>>, vector<16x128xbf16>
    %c0_4 = arith.constant 0 : index
    %c0_5 = arith.constant 0 : index
    %5 = vector.load %arg4[%c0_4, %c0_5] : memref<128x128xbf16, #tpu.memory_space<vmem>>, vector<128x128xbf16>
    %cst = arith.constant dense<0.000000e+00> : vector<16x128xf32>
    %6 = tpu.matmul %4, %5, %cst {dimension_numbers = #tpu.dot_dimension_numbers<[1], [0], [0], [1], [0, 0, 1, 1], [], []>} : vector<16x128xbf16>, vector<128x128xbf16>, vector<16x128xf32> -> vector<16x128xf32>
    %7 = arith.addf %3, %6 : vector<16x128xf32>
    %c0_6 = arith.constant 0 : index
    %c0_7 = arith.constant 0 : index
    %8 = vector.load %arg6[%c0_6, %c0_7] : memref<16x128xf32, #tpu.memory_space<vmem>>, vector<16x128xf32>
    tpu.vector_store %arg6[%c0_6, %c0_7], %7 {strides = array<i32>} : memref<16x128xf32, #tpu.memory_space<vmem>>, vector<16x128xf32>,
    return
  }
  func.func @transform_0(%arg0: i32, %arg1: i32, %arg2: i32) -> (i32, i32) {
    %c0_i32 = arith.constant 0 : i32
    return %arg0, %arg2 : i32, i32
  }
  func.func @transform_1(%arg0: i32, %arg1: i32, %arg2: i32) -> (i32, i32) {
    %c0_i32 = arith.constant 0 : i32
    return %arg2, %arg1 : i32, i32
  }
  func.func @transform_2(%arg0: i32, %arg1: i32, %arg2: i32) -> (i32, i32) {
    %c0_i32 = arith.constant 0 : i32
    %c0_i32_0 = arith.constant 0 : i32
    return %c0_i32, %arg1 : i32, i32
  }
  func.func @transform_3(%arg0: i32, %arg1: i32, %arg2: i32) -> (i32, i32) {
    %c0_i32 = arith.constant 0 : i32
    return %arg0, %arg1 : i32, i32
  }
}

</mosaic_0001>

<bundles_post_ra>
// kernel: apply.1
= control target key start
LH: loop header
LB: loop body
LE: loop exit
PB: predicated region body
PF: predicated region fallthrough
CT: control target
= control target key end

     0   :  { %8 = vsyncpa [#allocation3], 0  ;;  %s243_s12 = smov [#allocation2]   ;;  %s292_s0 = inlined_call_operand.vmem [shape: bf16[16,128], index: 0, kind: input, shape index: {}]   ;;  %s293_s1 = inlined_call_operand.hbm [shape: bf16[128,128], index: 1, kind: input, shape index: {}]   ;;  %s294_s2 = inlined_call_operand.vmem [shape: f32[1,128], index: 2, kind: input, shape index: {}]   ;;  %s295_s3 = inlined_call_operand.vmem [shape: f32[16,128], index: 3, kind: output, shape index: {}]  }
   0x1   :  { %s16_s13 = sshll.u32 %s243_s12, 4  ;;  %s219_s16 = scalar_lea.hbm %s293_s1, 1024  ;;  %s17_s13 = int_to_ptr.vmem [resolvable:$true] %s16_s13 }
   0x2   :  { %p220_p0 = scmp.ne.s32.totalorder %s293_s1, %s219_s16  ;;  %p223_p1 = scmp.lt.u32.totalorder %s219_s16, %s293_s1 }
   0x4   :  { %p225_p2 = pnand %p223_p1, %p220_p0 }
   0x6   :  { %228 = shalt.err (!%p225_p2)
}
   0x7   :  { %s229_s21 = scalar_lea.vmem %s17_s13, 1024  ;;  %p234_p4 = scmp.lt.s32.totalorder %s17_s13, %s17_s13 }
   0x8   :  { %p230_p3 = scmp.ne.s32.totalorder %s17_s13, %s229_s21  ;;  %p235_p5 = scmp.lt.s32.totalorder %s229_s21, %s229_s21 }
   0xa   :  { %p236_p6 = por %p235_p5, %p234_p4 }
   0xc   :  { %p237_p7 = pnand %p236_p6, %p230_p3 }
   0xe   :  { %240 = shalt.err (!%p237_p7)
}
   0xf   :  { %s244_s22 = smov 64   ;;  %s245_s23 = smov 4  }
  0x10   :  { %22 = dma.hbm_to_vmem [thread:$0]  %s293_s1, 1024, %s17_s13, [#allocation3], %s244_s22, %s244_s22, %s245_s23  }
  0x11   :  { %241 = dma.done.wait [#allocation3], 1024  }
  0x12   :  { %242 = vsyncadd [#allocation3], 4294966272  ;;  %v246_v0 = vmov 0.0   ;;  %vm247_vm0 = vmmov 0   ;;  %v210_v1 = vld [vmem:[#allocation2] sm:$0xff]   ;;  %v211_v2 = vld [vmem:[#allocation2 + $0x8] sm:$0xff]  }
  0x13   :  { %185 = vmatprep.subr.bf16.mxu0 %v246_v0  ;;  %201 = vmatprep.mubr.msk.bf16.mxu0 %vm247_vm0, %v246_v0  ;;  %v212_v3 = vld [vmem:[#allocation2 + $0x10] sm:$0xff]   ;;  %v213_v4 = vld [vmem:[#allocation2 + $0x18] sm:$0xff]   ;;  %v214_v5 = vld [vmem:[#allocation2 + $0x20] sm:$0xff]  }
  0x14   :  { %186 = vmatpush3.bf16.msra.mxu0 %v210_v1  ;;  %v215_v6 = vld [vmem:[#allocation2 + $0x28] sm:$0xff]   ;;  %v216_v7 = vld [vmem:[#allocation2 + $0x30] sm:$0xff]   ;;  %v217_v8 = vld [vmem:[#allocation2 + $0x38] sm:$0xff]  }
  0x15   :  { %187 = vmatprep.subr.bf16.mxu0 %v246_v0  ;;  %v218_v9 = vld [vmem:[%s292_s0] sm:$0xff]  }
  0x16   :  { %v166_v10 = vld [vmem:[%s294_s2] ss:$0 sm:$0xff] }
  0x18   :  { %188 = vmatpush3.bf16.msra.mxu0 %v211_v2 }
  0x19   :  { %189 = vmatprep.subr.bf16.mxu0 %v246_v0 }
  0x1c   :  { %190 = vmatpush3.bf16.msra.mxu0 %v212_v3 }
  0x1d   :  { %191 = vmatprep.subr.bf16.mxu0 %v246_v0 }
  0x20   :  { %192 = vmatpush3.bf16.msra.mxu0 %v213_v4 }
  0x21   :  { %193 = vmatprep.subr.bf16.mxu0 %v246_v0 }
  0x24   :  { %194 = vmatpush3.bf16.msra.mxu0 %v214_v5 }
  0x25   :  { %195 = vmatprep.subr.bf16.mxu0 %v246_v0 }
  0x28   :  { %196 = vmatpush3.bf16.msra.mxu0 %v215_v6 }
  0x29   :  { %197 = vmatprep.subr.bf16.mxu0 %v246_v0 }
  0x2c   :  { %198 = vmatpush3.bf16.msra.mxu0 %v216_v7 }
  0x2d   :  { %199 = vmatprep.subr.bf16.mxu0 %v246_v0 }
  0x30   :  { %200 = vmatpush3.bf16.msra.mxu0 %v217_v8 }
  0x33   :  { %202 = vmatmul.mubr.bf16.vlgmr.msra.gmra.mrb[0].mxu0 %v218_v9 }
 0x106   :  { %v150_v11 = vpop.f32.mrb[0].mxu0 }
 0x107   :  { %v157_v12 = vadd.f32 %v166_v10, %v150_v11  ;;  %v203_v13 = vpop.f32.mrb[1].mxu0 }
 0x108   :  { %v153_v14 = vpop.f32.mrb[2].mxu0 }
 0x109   :  { %159 = vst [vmem:[%s295_s3] sm:$0xff] %v157_v12  ;;  %v158_v15 = vadd.f32 %v166_v10, %v153_v14  ;;  %v204_v16 = vpop.f32.mrb[3].mxu0 }
 0x10b   :  { %160 = vst [vmem:[%s295_s3 + $0x8] sm:$0xff] %v158_v15 }
 0x10c   :  { %165 = vsyncpa [#allocation3], 1 }

</bundles_post_ra>
